<compile_context>
chip_gen: v6e
topology: v6e:2x2x1
jax: 0.10.0
libtpu: 0.0.40
codegen_flags: <defaults>
</compile_context>

<pallas_src>
import jax
import jax.numpy as jnp
from jax.experimental import pallas as pl
from jax.experimental.pallas import tpu as pltpu

IN_FEATURES = 2
HIDDEN = 8


def xor_mlp_kernel(w1_ref, b1_ref, w2_ref, b2_ref, x_ref, o_ref):
    """One batch tile of the XOR MLP.

    w1_ref: (16,) f32 SMEM  -- fc1.weight (torch [out, in] layout), flattened
    b1_ref: (8,)  f32 SMEM  -- fc1.bias
    w2_ref: (8,)  f32 SMEM  -- fc2.weight, flattened
    b2_ref: (1,)  f32 SMEM  -- fc2.bias
    x_ref : (2, TB) f32 VMEM -- inputs, batch mapped to lanes
    o_ref : (1, TB) f32 VMEM -- sigmoid outputs, lane-dense
    """
    x0 = x_ref[0:1, :]          # (1, TB)
    x1 = x_ref[1:2, :]          # (1, TB)

    # fc2 accumulator, initialised with its bias (scalar from SMEM).
    z = jnp.zeros_like(x0) + b2_ref[0]

    # Unrolled over the 8 hidden units: pure VPU FMAs with SMEM scalar
    # operands.  A K=2 / K=8 contraction would waste the MXU but still pay
    # vmatmul push + result-FIFO pop latency, so we keep it off entirely.
    for j in range(HIDDEN):
        h_j = jnp.maximum(
            w1_ref[IN_FEATURES * j] * x0
            + w1_ref[IN_FEATURES * j + 1] * x1
            + b1_ref[j],
            0.0,
        )
        z = z + w2_ref[j] * h_j

    # Sigmoid lowers to EUP exp + reciprocal (separate issue slot from the VPU).
    o_ref[...] = jax.nn.sigmoid(z).astype(o_ref.dtype)


def _round_up(n, m):
    return ((n + m - 1) // m) * m


def xor_forward(x, w1, b1, w2, b2, *, lane_tile=16 * 1024):
    """Forward pass of XORModel.

    x : (B, 2) float  -- torch-style (batch, features)
    w1: (8, 2)        -- fc1.weight (torch [out_features, in_features])
    b1: (8,)          -- fc1.bias
    w2: (1, 8)        -- fc2.weight
    b2: (1,)          -- fc2.bias
    Returns (B, 1) float32 == torch.sigmoid(fc2(relu(fc1(x)))).
    """
    assert lane_tile % 128 == 0
    B = x.shape[0]

    w1f = jnp.asarray(w1, jnp.float32).reshape(IN_FEATURES * HIDDEN)
    b1f = jnp.asarray(b1, jnp.float32).reshape(HIDDEN)
    w2f = jnp.asarray(w2, jnp.float32).reshape(HIDDEN)
    b2f = jnp.asarray(b2, jnp.float32).reshape(1)

    single_block = B <= lane_tile
    b_pad = _round_up(B, 128) if single_block else _round_up(B, lane_tile)

    # Batch-in-lanes layout: transpose in the wrapper and zero-pad the lane
    # axis to a multiple of 128 so in-kernel stores are lane-dense.
    xt = jnp.zeros((IN_FEATURES, b_pad), jnp.float32)
    xt = xt.at[:, :B].set(jnp.asarray(x, jnp.float32).T)

    smem = pl.BlockSpec(memory_space=pltpu.MemorySpace.SMEM)
    vmem = pl.BlockSpec(memory_space=pltpu.MemorySpace.VMEM)
    out_shape = jax.ShapeDtypeStruct((1, b_pad), jnp.float32)

    if single_block:
        # Tiny problem: no grid at all -> no per-step pipeline bookkeeping.
        out = pl.pallas_call(
            xor_mlp_kernel,
            out_shape=out_shape,
            in_specs=[smem, smem, smem, smem, vmem],
            out_specs=vmem,
        )(w1f, b1f, w2f, b2f, xt)
    else:
        # Real batch sizes: tile only over the batch(lane) axis; the ~130 B of
        # parameters keep a constant whole-array SMEM window (no re-fetch).
        grid = (b_pad // lane_tile,)
        out = pl.pallas_call(
            xor_mlp_kernel,
            out_shape=out_shape,
            grid=grid,
            in_specs=[
                smem,
                smem,
                smem,
                smem,
                pl.BlockSpec((IN_FEATURES, lane_tile), lambda i: (0, i)),
            ],
            out_specs=pl.BlockSpec((1, lane_tile), lambda i: (0, i)),
            compiler_params=pltpu.CompilerParams(
                # v7x: both TensorCores split the batch tiles; harmless on
                # v5e/v6e (single TC).
                dimension_semantics=("parallel",),
            ),
        )(w1f, b1f, w2f, b2f, xt)

    return out[0, :B][:, None]   # (B, 1), matching the torch output shape


if __name__ == "__main__":
    key = jax.random.PRNGKey(0)
    kx, kp = jax.random.split(key)
    k1, k2, k3, k4 = jax.random.split(kp, 4)

    # Deterministic init mimicking nn.Linear's U(-1/sqrt(fan_in), 1/sqrt(fan_in)),
    # stored in torch parameter layout ([out_features, in_features]).
    bound1 = 1.0 / jnp.sqrt(2.0)
    bound2 = 1.0 / jnp.sqrt(8.0)
    w1 = jax.random.uniform(k1, (HIDDEN, IN_FEATURES), jnp.float32, -bound1, bound1)
    b1 = jax.random.uniform(k2, (HIDDEN,), jnp.float32, -bound1, bound1)
    w2 = jax.random.uniform(k3, (1, HIDDEN), jnp.float32, -bound2, bound2)
    b2 = jax.random.uniform(k4, (1,), jnp.float32, -bound2, bound2)

    def ref_forward(xx):
        # Plain-JAX reference in pure f32 elementwise math (avoids TPU matmul
        # default-precision ambiguity), same semantics as the torch module.
        h = jnp.maximum(jnp.sum(xx[:, None, :] * w1[None, :, :], axis=-1) + b1, 0.0)
        z = jnp.sum(h * w2.reshape(1, HIDDEN), axis=-1, keepdims=True) + b2
        return jax.nn.sigmoid(z)

    # Small demo batch (repeated XOR truth table) -> single-block, no-grid path.
    truth = jnp.array([[0.0, 0.0], [0.0, 1.0], [1.0, 0.0], [1.0, 1.0]], jnp.float32)
    x_small = jnp.tile(truth, (2, 1))                                   # (8, 2)
    out_small = jax.block_until_ready(xor_forward(x_small, w1, b1, w2, b2))
    assert out_small.shape == (x_small.shape[0], 1)
    assert jnp.allclose(out_small, ref_forward(x_small), atol=1e-5, rtol=1e-5)

    # Exercise the batch-tiled (gridded) path at a still-small shape by
    # shrinking the lane tile: B=300 -> padded to 384 -> grid of 3 tiles.
    x_big = jax.random.uniform(kx, (300, IN_FEATURES), jnp.float32)
    out_big = jax.block_until_ready(
        xor_forward(x_big, w1, b1, w2, b2, lane_tile=128))
    assert out_big.shape == (x_big.shape[0], 1)
    assert jnp.allclose(out_big, ref_forward(x_big), atol=1e-5, rtol=1e-5)

    print("KERNEL_OK")
</pallas_src>

<mosaic_0001>
module attributes {stable_mosaic.version = 11 : i64} {
  func.func @xor_mlp_kernel(%arg0: memref<16xf32, #tpu.memory_space<smem>>, %arg1: memref<8xf32, #tpu.memory_space<smem>>, %arg2: memref<8xf32, #tpu.memory_space<smem>>, %arg3: memref<1xf32, #tpu.memory_space<smem>>, %arg4: memref<2x128xf32, #tpu.memory_space<vmem>>, %arg5: memref<1x128xf32, #tpu.memory_space<vmem>>) attributes {dimension_semantics = [], scalar_prefetch = 0 : i64, scratch_operands = 0 : i64, tpu.core_type = #tpu.core_type<tc>} {
    %c0 = arith.constant 0 : index
    %c0_0 = arith.constant 0 : index
    %0 = vector.load %arg4[%c0, %c0_0] : memref<2x128xf32, #tpu.memory_space<vmem>>, vector<1x128xf32>
    %c1 = arith.constant 1 : index
    %c0_1 = arith.constant 0 : index
    %1 = vector.load %arg4[%c1, %c0_1] : memref<2x128xf32, #tpu.memory_space<vmem>>, vector<1x128xf32>
    %cst = arith.constant 0.000000e+00 : f32
    %2 = vector.broadcast %cst : f32 to vector<1x128xf32>
    %c0_2 = arith.constant 0 : index
    %3 = memref.load %arg3[%c0_2] : memref<1xf32, #tpu.memory_space<smem>>
    %4 = vector.broadcast %3 : f32 to vector<1x128xf32>
    %5 = arith.addf %2, %4 : vector<1x128xf32>
    %c0_3 = arith.constant 0 : index
    %6 = memref.load %arg0[%c0_3] : memref<16xf32, #tpu.memory_space<smem>>
    %7 = vector.broadcast %6 : f32 to vector<1x128xf32>
    %8 = arith.mulf %7, %0 : vector<1x128xf32>
    %c1_4 = arith.constant 1 : index
    %9 = memref.load %arg0[%c1_4] : memref<16xf32, #tpu.memory_space<smem>>
    %10 = vector.broadcast %9 : f32 to vector<1x128xf32>
    %11 = arith.mulf %10, %1 : vector<1x128xf32>
    %12 = arith.addf %8, %11 : vector<1x128xf32>
    %c0_5 = arith.constant 0 : index
    %13 = memref.load %arg1[%c0_5] : memref<8xf32, #tpu.memory_space<smem>>
    %14 = vector.broadcast %13 : f32 to vector<1x128xf32>
    %15 = arith.addf %12, %14 : vector<1x128xf32>
    %cst_6 = arith.constant 0.000000e+00 : f32
    %16 = vector.broadcast %cst_6 : f32 to vector<1x128xf32>
    %17 = arith.maximumf %15, %16 : vector<1x128xf32>
    %c0_7 = arith.constant 0 : index
    %18 = memref.load %arg2[%c0_7] : memref<8xf32, #tpu.memory_space<smem>>
    %19 = vector.broadcast %18 : f32 to vector<1x128xf32>
    %20 = arith.mulf %19, %17 : vector<1x128xf32>
    %21 = arith.addf %5, %20 : vector<1x128xf32>
    %c2 = arith.constant 2 : index
    %22 = memref.load %arg0[%c2] : memref<16xf32, #tpu.memory_space<smem>>
    %23 = vector.broadcast %22 : f32 to vector<1x128xf32>
    %24 = arith.mulf %23, %0 : vector<1x128xf32>
    %c3 = arith.constant 3 : index
    %25 = memref.load %arg0[%c3] : memref<16xf32, #tpu.memory_space<smem>>
    %26 = vector.broadcast %25 : f32 to vector<1x128xf32>
    %27 = arith.mulf %26, %1 : vector<1x128xf32>
    %28 = arith.addf %24, %27 : vector<1x128xf32>
    %c1_8 = arith.constant 1 : index
    %29 = memref.load %arg1[%c1_8] : memref<8xf32, #tpu.memory_space<smem>>
    %30 = vector.broadcast %29 : f32 to vector<1x128xf32>
    %31 = arith.addf %28, %30 : vector<1x128xf32>
    %cst_9 = arith.constant 0.000000e+00 : f32
    %32 = vector.broadcast %cst_9 : f32 to vector<1x128xf32>
    %33 = arith.maximumf %31, %32 : vector<1x128xf32>
    %c1_10 = arith.constant 1 : index
    %34 = memref.load %arg2[%c1_10] : memref<8xf32, #tpu.memory_space<smem>>
    %35 = vector.broadcast %34 : f32 to vector<1x128xf32>
    %36 = arith.mulf %35, %33 : vector<1x128xf32>
    %37 = arith.addf %21, %36 : vector<1x128xf32>
    %c4 = arith.constant 4 : index
    %38 = memref.load %arg0[%c4] : memref<16xf32, #tpu.memory_space<smem>>
    %39 = vector.broadcast %38 : f32 to vector<1x128xf32>
    %40 = arith.mulf %39, %0 : vector<1x128xf32>
    %c5 = arith.constant 5 : index
    %41 = memref.load %arg0[%c5] : memref<16xf32, #tpu.memory_space<smem>>
    %42 = vector.broadcast %41 : f32 to vector<1x128xf32>
    %43 = arith.mulf %42, %1 : vector<1x128xf32>
    %44 = arith.addf %40, %43 : vector<1x128xf32>
    %c2_11 = arith.constant 2 : index
    %45 = memref.load %arg1[%c2_11] : memref<8xf32, #tpu.memory_space<smem>>
    %46 = vector.broadcast %45 : f32 to vector<1x128xf32>
    %47 = arith.addf %44, %46 : vector<1x128xf32>
    %cst_12 = arith.constant 0.000000e+00 : f32
    %48 = vector.broadcast %cst_12 : f32 to vector<1x128xf32>
    %49 = arith.maximumf %47, %48 : vector<1x128xf32>
    %c2_13 = arith.constant 2 : index
    %50 = memref.load %arg2[%c2_13] : memref<8xf32, #tpu.memory_space<smem>>
    %51 = vector.broadcast %50 : f32 to vector<1x128xf32>
    %52 = arith.mulf %51, %49 : vector<1x128xf32>
    %53 = arith.addf %37, %52 : vector<1x128xf32>
    %c6 = arith.constant 6 : index
    %54 = memref.load %arg0[%c6] : memref<16xf32, #tpu.memory_space<smem>>
    %55 = vector.broadcast %54 : f32 to vector<1x128xf32>
    %56 = arith.mulf %55, %0 : vector<1x128xf32>
    %c7 = arith.constant 7 : index
    %57 = memref.load %arg0[%c7] : memref<16xf32, #tpu.memory_space<smem>>
    %58 = vector.broadcast %57 : f32 to vector<1x128xf32>
    %59 = arith.mulf %58, %1 : vector<1x128xf32>
    %60 = arith.addf %56, %59 : vector<1x128xf32>
    %c3_14 = arith.constant 3 : index
    %61 = memref.load %arg1[%c3_14] : memref<8xf32, #tpu.memory_space<smem>>
    %62 = vector.broadcast %61 : f32 to vector<1x128xf32>
    %63 = arith.addf %60, %62 : vector<1x128xf32>
    %cst_15 = arith.constant 0.000000e+00 : f32
    %64 = vector.broadcast %cst_15 : f32 to vector<1x128xf32>
    %65 = arith.maximumf %63, %64 : vector<1x128xf32>
    %c3_16 = arith.constant 3 : index
    %66 = memref.load %arg2[%c3_16] : memref<8xf32, #tpu.memory_space<smem>>
    %67 = vector.broadcast %66 : f32 to vector<1x128xf32>
    %68 = arith.mulf %67, %65 : vector<1x128xf32>
    %69 = arith.addf %53, %68 : vector<1x128xf32>
    %c8 = arith.constant 8 : index
    %70 = memref.load %arg0[%c8] : memref<16xf32, #tpu.memory_space<smem>>
    %71 = vector.broadcast %70 : f32 to vector<1x128xf32>
    %72 = arith.mulf %71, %0 : vector<1x128xf32>
    %c9 = arith.constant 9 : index
    %73 = memref.load %arg0[%c9] : memref<16xf32, #tpu.memory_space<smem>>
    %74 = vector.broadcast %73 : f32 to vector<1x128xf32>
    %75 = arith.mulf %74, %1 : vector<1x128xf32>
    %76 = arith.addf %72, %75 : vector<1x128xf32>
    %c4_17 = arith.constant 4 : index
    %77 = memref.load %arg1[%c4_17] : memref<8xf32, #tpu.memory_space<smem>>
    %78 = vector.broadcast %77 : f32 to vector<1x128xf32>
    %79 = arith.addf %76, %78 : vector<1x128xf32>
    %cst_18 = arith.constant 0.000000e+00 : f32
    %80 = vector.broadcast %cst_18 : f32 to vector<1x128xf32>
    %81 = arith.maximumf %79, %80 : vector<1x128xf32>
    %c4_19 = arith.constant 4 : index
    %82 = memref.load %arg2[%c4_19] : memref<8xf32, #tpu.memory_space<smem>>
    %83 = vector.broadcast %82 : f32 to vector<1x128xf32>
    %84 = arith.mulf %83, %81 : vector<1x128xf32>
    %85 = arith.addf %69, %84 : vector<1x128xf32>
    %c10 = arith.constant 10 : index
    %86 = memref.load %arg0[%c10] : memref<16xf32, #tpu.memory_space<smem>>
    %87 = vector.broadcast %86 : f32 to vector<1x128xf32>
    %88 = arith.mulf %87, %0 : vector<1x128xf32>
    %c11 = arith.constant 11 : index
    %89 = memref.load %arg0[%c11] : memref<16xf32, #tpu.memory_space<smem>>
    %90 = vector.broadcast %89 : f32 to vector<1x128xf32>
    %91 = arith.mulf %90, %1 : vector<1x128xf32>
    %92 = arith.addf %88, %91 : vector<1x128xf32>
    %c5_20 = arith.constant 5 : index
    %93 = memref.load %arg1[%c5_20] : memref<8xf32, #tpu.memory_space<smem>>
    %94 = vector.broadcast %93 : f32 to vector<1x128xf32>
    %95 = arith.addf %92, %94 : vector<1x128xf32>
    %cst_21 = arith.constant 0.000000e+00 : f32
    %96 = vector.broadcast %cst_21 : f32 to vector<1x128xf32>
    %97 = arith.maximumf %95, %96 : vector<1x128xf32>
    %c5_22 = arith.constant 5 : index
    %98 = memref.load %arg2[%c5_22] : memref<8xf32, #tpu.memory_space<smem>>
    %99 = vector.broadcast %98 : f32 to vector<1x128xf32>
    %100 = arith.mulf %99, %97 : vector<1x128xf32>
    %101 = arith.addf %85, %100 : vector<1x128xf32>
    %c12 = arith.constant 12 : index
    %102 = memref.load %arg0[%c12] : memref<16xf32, #tpu.memory_space<smem>>
    %103 = vector.broadcast %102 : f32 to vector<1x128xf32>
    %104 = arith.mulf %103, %0 : vector<1x128xf32>
    %c13 = arith.constant 13 : index
    %105 = memref.load %arg0[%c13] : memref<16xf32, #tpu.memory_space<smem>>
    %106 = vector.broadcast %105 : f32 to vector<1x128xf32>
    %107 = arith.mulf %106, %1 : vector<1x128xf32>
    %108 = arith.addf %104, %107 : vector<1x128xf32>
    %c6_23 = arith.constant 6 : index
    %109 = memref.load %arg1[%c6_23] : memref<8xf32, #tpu.memory_space<smem>>
    %110 = vector.broadcast %109 : f32 to vector<1x128xf32>
    %111 = arith.addf %108, %110 : vector<1x128xf32>
    %cst_24 = arith.constant 0.000000e+00 : f32
    %112 = vector.broadcast %cst_24 : f32 to vector<1x128xf32>
    %113 = arith.maximumf %111, %112 : vector<1x128xf32>
    %c6_25 = arith.constant 6 : index
    %114 = memref.load %arg2[%c6_25] : memref<8xf32, #tpu.memory_space<smem>>
    %115 = vector.broadcast %114 : f32 to vector<1x128xf32>
    %116 = arith.mulf %115, %113 : vector<1x128xf32>
    %117 = arith.addf %101, %116 : vector<1x128xf32>
    %c14 = arith.constant 14 : index
    %118 = memref.load %arg0[%c14] : memref<16xf32, #tpu.memory_space<smem>>
    %119 = vector.broadcast %118 : f32 to vector<1x128xf32>
    %120 = arith.mulf %119, %0 : vector<1x128xf32>
    %c15 = arith.constant 15 : index
    %121 = memref.load %arg0[%c15] : memref<16xf32, #tpu.memory_space<smem>>
    %122 = vector.broadcast %121 : f32 to vector<1x128xf32>
    %123 = arith.mulf %122, %1 : vector<1x128xf32>
    %124 = arith.addf %120, %123 : vector<1x128xf32>
    %c7_26 = arith.constant 7 : index
    %125 = memref.load %arg1[%c7_26] : memref<8xf32, #tpu.memory_space<smem>>
    %126 = vector.broadcast %125 : f32 to vector<1x128xf32>
    %127 = arith.addf %124, %126 : vector<1x128xf32>
    %cst_27 = arith.constant 0.000000e+00 : f32
    %128 = vector.broadcast %cst_27 : f32 to vector<1x128xf32>
    %129 = arith.maximumf %127, %128 : vector<1x128xf32>
    %c7_28 = arith.constant 7 : index
    %130 = memref.load %arg2[%c7_28] : memref<8xf32, #tpu.memory_space<smem>>
    %131 = vector.broadcast %130 : f32 to vector<1x128xf32>
    %132 = arith.mulf %131, %129 : vector<1x128xf32>
    %133 = arith.addf %117, %132 : vector<1x128xf32>
    %134 = arith.negf %133 : vector<1x128xf32>
    %135 = math.exp %134 : vector<1x128xf32>
    %cst_29 = arith.constant 1.000000e+00 : f32
    %136 = vector.broadcast %cst_29 : f32 to vector<1x128xf32>
    %137 = arith.addf %136, %135 : vector<1x128xf32>
    %138 = arith.divf %136, %137 : vector<1x128xf32>
    %c0_30 = arith.constant 0 : index
    %c0_31 = arith.constant 0 : index
    %139 = vector.load %arg5[%c0_30, %c0_31] : memref<1x128xf32, #tpu.memory_space<vmem>>, vector<1x128xf32>
    tpu.vector_store %arg5[%c0_30, %c0_31], %138 {strides = array<i32>} : memref<1x128xf32, #tpu.memory_space<vmem>>, vector<1x128xf32>,
    return
  }
}

</mosaic_0001>

<bundles_post_ra>
// kernel: tpu_custom_call.1
= control target key start
LH: loop header
LB: loop body
LE: loop exit
PB: predicated region body
PF: predicated region fallthrough
CT: control target
= control target key end

     0   :  { %11 = vsyncpa [#allocation6], 0  ;;  %s415_s0 = inlined_call_operand.vmem [shape: f32[16], index: 0, kind: input, shape index: {}]   ;;  %s416_s1 = inlined_call_operand.hbm [shape: f32[8], index: 1, kind: input, shape index: {}]   ;;  %s417_s2 = inlined_call_operand.vmem [shape: f32[8], index: 2, kind: input, shape index: {}]   ;;  %s418_s3 = inlined_call_operand.<no memory space> [shape: f32[1], index: 3, kind: input, shape index: {}]   ;;  %s419_s4 = inlined_call_operand.vmem [shape: f32[2,128], index: 4, kind: input, shape index: {}]   ;;  %s420_s5 = inlined_call_operand.hbm [shape: f32[1,128], index: 5, kind: output, shape index: {}]  }
   0x1   :  { %12 = vsyncpa [#allocation5], 0 }
   0x2   :  { %13 = vsyncpa [#allocation9], 0 }
   0x3   :  { %14 = vsyncpa [#allocation4], 0  ;;  %s21_s20 = sshll.u32 %s415_s0, 4  ;;  %s22_s20 = int_to_ptr.vmem [resolvable:$true] %s21_s20 }
   0x4   :  { %s244_s21 = scalar_lea.vmem %s22_s20, 16  ;;  %p249_p1 = scmp.lt.s32.totalorder %s22_s20, %s22_s20 }
   0x5   :  { %p245_p0 = scmp.ne.s32.totalorder %s22_s20, %s244_s21  ;;  %p250_p2 = scmp.lt.s32.totalorder %s244_s21, %s244_s21 }
   0x7   :  { %p251_p3 = por %p250_p2, %p249_p1 }
   0x9   :  { %p252_p4 = pnand %p251_p3, %p245_p0 }
   0xb   :  { %255 = shalt.err (!%p252_p4)
}
   0xc   :  { %s304_s22 = smov [#allocation3]   ;;  %s305_s23 = smov [#allocation7]  }
   0xd   :  { %24 = dma.vmem_to_smem %s22_s20, 16, %s304_s22, [#allocation6]  }
   0xe   :  { %32 = dma.hbm_to_smem %s416_s1, 16, %s305_s23, [#allocation5]  }
   0xf   :  { %s39_s28 = sshll.u32 %s417_s2, 4  ;;  %s40_s28 = int_to_ptr.vmem [resolvable:$true] %s39_s28 }
  0x10   :  { %s264_s0 = scalar_lea.vmem %s40_s28, 16  ;;  %p269_p6 = scmp.lt.s32.totalorder %s40_s28, %s40_s28 }
  0x11   :  { %p265_p5 = scmp.ne.s32.totalorder %s40_s28, %s264_s0  ;;  %p270_p7 = scmp.lt.s32.totalorder %s264_s0, %s264_s0 }
  0x13   :  { %p271_p8 = por %p270_p7, %p269_p6 }
  0x15   :  { %p272_p9 = pnand %p271_p8, %p265_p5 }
  0x17   :  { %275 = shalt.err (!%p272_p9)
}
  0x18   :  { %s306_s29 = smov [#allocation8]  }
  0x19   :  { %42 = dma.vmem_to_smem %s40_s28, 16, %s306_s29, [#allocation9]  }
  0x1a   :  { %296 = dma.done.wait [#allocation6], 16  }
  0x1b   :  { %297 = vsyncadd [#allocation6], 4294967280 }
  0x1c   :  { %298 = dma.done.wait [#allocation5], 16  }
  0x1d   :  { %299 = vsyncadd [#allocation5], 4294967280 }
  0x1e   :  { %300 = dma.done.wait [#allocation9], 16  }
  0x1f   :  { %301 = vsyncadd [#allocation9], 4294967280 }
  0x20   :  { %56 = sfence }
  0x21   :  { %s62_s1 = sld [smem:[#allocation3]]  ;;  %v352_v0 = vld [vmem:[%s419_s4] sm:$0x1]  ;;  %v357_v1 = vld [vmem:[%s419_s4 + $0x1] sm:$0x1]  ;;  %v60_v18 = vstv %s418_s3  ;;  %s307_s11 = smov [#allocation10]  }
  0x22   :  { %s206_s30 = sld [smem:[#allocation3 + $0x1]] }
  0x23   :  { %s69_s2 = sld [smem:[#allocation7]] }
  0x24   :  { %s347_s6 = sld [smem:[#allocation8]] }
  0x25   :  { %s207_s9 = sld [smem:[#allocation3 + $0x2]] }
  0x26   :  { %s208_s12 = sld [smem:[#allocation3 + $0x3]] }
  0x27   :  { %v63_v2 = vstv %s62_s1  ;;  %s209_s13 = sld [smem:[#allocation7 + $0x1]] }
  0x28   :  { %v64_v3 = vmul.f32 %v63_v2, %v352_v0  ;;  %v66_v4 = vstv %s206_s30  ;;  %s360_s14 = sld [smem:[#allocation8 + $0x1]] }
  0x29   :  { %v67_v5 = vmul.f32 %v66_v4, %v357_v1  ;;  %s211_s15 = sld [smem:[#allocation3 + $0x4]]  ;;  %v70_v6 = vstv %s69_s2 }
  0x2a   :  { %s212_s16 = sld [smem:[#allocation3 + $0x5]]  ;;  %v74_v13 = vstv %s347_s6 }
  0x2b   :  { %v68_v7 = vadd.f32 %v67_v5, %v64_v3  ;;  %v78_v8 = vstv %s207_s9  ;;  %s363_s17 = sld [smem:[#allocation7 + $0x2]] }
  0x2c   :  { %v79_v9 = vmul.f32 %v78_v8, %v352_v0  ;;  %v81_v10 = vstv %s208_s12  ;;  %s366_s4 = sld [smem:[#allocation8 + $0x2]]  ;;  %s195_s12 = sshll.u32 %s307_s11, 4  ;;  %s196_s12 = int_to_ptr.vmem [resolvable:$true] %s195_s12 }
  0x2d   :  { %v71_v11 = vadd.f32 %v70_v6, %v68_v7  ;;  %v82_v12 = vmul.f32 %v81_v10, %v357_v1  ;;  %s215_s18 = sld [smem:[#allocation3 + $0x6]]  ;;  %v85_v14 = vstv %s209_s13  ;;  %s276_s13 = scalar_lea.vmem %s196_s12, 16 }
  0x2e   :  { %s216_s19 = sld [smem:[#allocation3 + $0x7]]  ;;  %v89_v24 = vstv %s360_s14  ;;  %p277_p10 = scmp.ne.s32.totalorder %s196_s12, %s276_s13 }
  0x2f   :  { %v72_v15 = vmax.f32 %v71_v11, 0.0  ;;  %v83_v16 = vadd.f32 %v82_v12, %v79_v9  ;;  %v93_v17 = vstv %s211_s15  ;;  %s370_s20 = sld [smem:[#allocation7 + $0x3]]  ;;  %s280_s14 = scalar_lea.vmem %s196_s12, 32 }
  0x30   :  { %v94_v19 = vmul.f32 %v93_v17, %v352_v0  ;;  %v96_v20 = vstv %s212_s16  ;;  %s376_s23 = sld [smem:[#allocation8 + $0x3]]  ;;  %p281_p11 = scmp.lt.s32.totalorder %s196_s12, %s196_s12 }
  0x31   :  { %v75_v21 = vmul.f32 %v74_v13, %v72_v15  ;;  %v86_v22 = vadd.f32 %v85_v14, %v83_v16  ;;  %v97_v23 = vmul.f32 %v96_v20, %v357_v1  ;;  %s219_s24 = sld [smem:[#allocation3 + $0x8]]  ;;  %v100_v25 = vstv %s363_s17  ;;  %p282_p12 = scmp.lt.s32.totalorder %s280_s14, %s276_s13 }
  0x32   :  { %s220_s25 = sld [smem:[#allocation3 + $0x9]]  ;;  %v104_v35 = vstv %s366_s4 }
  0x33   :  { %v76_v26 = vadd.f32 %v75_v21, %v60_v18  ;;  %v87_v27 = vmax.f32 %v86_v22, 0.0  ;;  %v98_v28 = vadd.f32 %v97_v23, %v94_v19  ;;  %v108_v29 = vstv %s215_s18  ;;  %s381_s3 = sld [smem:[#allocation7 + $0x4]]  ;;  %p283_p13 = por %p282_p12, %p281_p11 }
  0x34   :  { %v109_v30 = vmul.f32 %v108_v29, %v352_v0  ;;  %v111_v31 = vstv %s216_s19  ;;  %s384_s26 = sld [smem:[#allocation8 + $0x4]] }
  0x35   :  { %v90_v32 = vmul.f32 %v89_v24, %v87_v27  ;;  %v101_v33 = vadd.f32 %v100_v25, %v98_v28  ;;  %v112_v34 = vmul.f32 %v111_v31, %v357_v1  ;;  %s223_s27 = sld [smem:[#allocation3 + $0xa]]  ;;  %v115_v36 = vstv %s370_s20  ;;  %p284_p0 = pnand %p283_p13, %p277_p10 }
  0x36   :  { %s224_s28 = sld [smem:[#allocation3 + $0xb]]  ;;  %v119_v46 = vstv %s376_s23 }
  0x37   :  { %v91_v37 = vadd.f32 %v90_v32, %v76_v26  ;;  %v102_v38 = vmax.f32 %v101_v33, 0.0  ;;  %v113_v39 = vadd.f32 %v112_v34, %v109_v30  ;;  %v123_v40 = vstv %s219_s24  ;;  %s389_s0 = sld [smem:[#allocation7 + $0x5]] }
  0x38   :  { %v124_v41 = vmul.f32 %v123_v40, %v352_v0  ;;  %v126_v42 = vstv %s220_s25  ;;  %s392_s29 = sld [smem:[#allocation8 + $0x5]] }
  0x39   :  { %v105_v43 = vmul.f32 %v104_v35, %v102_v38  ;;  %v116_v44 = vadd.f32 %v115_v36, %v113_v39  ;;  %v127_v45 = vmul.f32 %v126_v42, %v357_v1  ;;  %s227_s1 = sld [smem:[#allocation3 + $0xc]]  ;;  %v130_v47 = vstv %s381_s3 }
  0x3a   :  { %s228_s30 = sld [smem:[#allocation3 + $0xd]]  ;;  %v134_v57 = vstv %s384_s26 }
  0x3b   :  { %v106_v48 = vadd.f32 %v105_v43, %v91_v37  ;;  %v117_v49 = vmax.f32 %v116_v44, 0.0  ;;  %v128_v50 = vadd.f32 %v127_v45, %v124_v41  ;;  %v138_v51 = vstv %s223_s27  ;;  %s397_s2 = sld [smem:[#allocation7 + $0x6]] }
  0x3c   :  { %v139_v52 = vmul.f32 %v138_v51, %v352_v0  ;;  %v141_v53 = vstv %s224_s28  ;;  %s400_s6 = sld [smem:[#allocation8 + $0x6]] }
  0x3d   :  { %v120_v54 = vmul.f32 %v119_v46, %v117_v49  ;;  %v131_v55 = vadd.f32 %v130_v47, %v128_v50  ;;  %v142_v56 = vmul.f32 %v141_v53, %v357_v1  ;;  %s231_s7 = sld [smem:[#allocation3 + $0xe]]  ;;  %v145_v58 = vstv %s389_s0 }
  0x3e   :  { %s232_s8 = sld [smem:[#allocation3 + $0xf]]  ;;  %v149_v6 = vstv %s392_s29 }
  0x3f   :  { %v121_v59 = vadd.f32 %v120_v54, %v106_v48  ;;  %v132_v60 = vmax.f32 %v131_v55, 0.0  ;;  %v143_v61 = vadd.f32 %v142_v56, %v139_v52  ;;  %v153_v62 = vstv %s227_s1  ;;  %s233_s9 = sld [smem:[#allocation7 + $0x7]] }
  0x40   :  { %v154_v63 = vmul.f32 %v153_v62, %v352_v0  ;;  %v156_v2 = vstv %s228_s30  ;;  %s234_s10 = sld [smem:[#allocation8 + $0x7]] }
  0x41   :  { %v135_v3 = vmul.f32 %v134_v57, %v132_v60  ;;  %v146_v4 = vadd.f32 %v145_v58, %v143_v61  ;;  %v157_v5 = vmul.f32 %v156_v2, %v357_v1  ;;  %v160_v7 = vstv %s397_s2 }
  0x42   :  { %v164_v17 = vstv %s400_s6 }
  0x43   :  { %v136_v8 = vadd.f32 %v135_v3, %v121_v59  ;;  %v147_v9 = vmax.f32 %v146_v4, 0.0  ;;  %v158_v10 = vadd.f32 %v157_v5, %v154_v63  ;;  %v168_v11 = vstv %s231_s7 }
  0x44   :  { %v169_v12 = vmul.f32 %v168_v11, %v352_v0  ;;  %v171_v13 = vstv %s232_s8 }
  0x45   :  { %v150_v14 = vmul.f32 %v149_v6, %v147_v9  ;;  %v161_v15 = vadd.f32 %v160_v7, %v158_v10  ;;  %v172_v16 = vmul.f32 %v171_v13, %v357_v1  ;;  %v175_v18 = vstv %s233_s9 }
  0x46   :  { %v179_v24 = vstv %s234_s10 }
  0x47   :  { %v151_v19 = vadd.f32 %v150_v14, %v136_v8  ;;  %v162_v20 = vmax.f32 %v161_v15, 0.0  ;;  %v173_v21 = vadd.f32 %v172_v16, %v169_v12 }
  0x49   :  { %v165_v22 = vmul.f32 %v164_v17, %v162_v20  ;;  %v176_v23 = vadd.f32 %v175_v18, %v173_v21 }
  0x4b   :  { %v166_v25 = vadd.f32 %v165_v22, %v151_v19  ;;  %v177_v26 = vmax.f32 %v176_v23, 0.0 }
  0x4d   :  { %v180_v27 = vmul.f32 %v179_v24, %v177_v26 }
  0x4f   :  { %v181_v28 = vadd.f32 %v180_v27, %v166_v25 }
  0x51   :  { %v235_v29 = vmul.f32 -1.442695, %v181_v28 }
  0x53   :  { %240 = vpow2.f32 %v235_v29 }
  0x60   :  { %v241_v0 = vpop.eup %240 }
  0x61   :  { %v185_v30 = vadd.f32 1.0, %v241_v0 }
  0x63   :  { %242 = vrcp.f32 %v185_v30 }
  0x70   :  { %v243_v1 = vpop.eup %242 }
  0x71   :  { %188 = vst [vmem:[#allocation10] sm:$0x1] %v243_v1 }
  0x72   :  { %287 = shalt.err (!%p284_p0)
}
  0x73   :  { %198 = dma.vmem_to_hbm [thread:$0]  %s196_s12, 16, %s420_s5, [#allocation4]  }
  0x74   :  { %302 = dma.done.wait [#allocation4], 16  }
  0x75   :  { %303 = vsyncadd [#allocation4], 4294967280 }
  0x76   :  { %202 = vsyncpa [#allocation4], 1 }
  0x77   :  { %203 = vsyncpa [#allocation5], 1 }
  0x78   :  { %204 = vsyncpa [#allocation6], 1 }
  0x79   :  { %205 = vsyncpa [#allocation9], 1 }

</bundles_post_ra>
